<compile_context>
chip_gen: v6e
topology: v6e:2x2x1
jax: 0.10.0
libtpu: 0.0.40
codegen_flags: <defaults>
</compile_context>

<pallas_src>
import functools
import numpy as np
import jax
import jax.numpy as jnp
from jax.experimental import pallas as pl
from jax.experimental.pallas import tpu as pltpu

VOCAB_SIZE = 6
END_IDX = 3
PADDING_IDX = 4
EMBEDDING_SIZE = 5
HIDDEN_SIZE = 32     # small hidden size for the demo (torch default is 100)
V_PAD = 128          # lane-dense readout width (avoid masked partial stores)


# ---------------------------------------------------------------------------
# Pallas kernel: fused input projection -> masked encoder RNN -> decoder RNN
#                -> batched lane-dense readout
# ---------------------------------------------------------------------------
def seq2seq_rnn_kernel(x_aug_ref,     # (T_in*B + T_dec*B, 2E+2) f32, row=t*B+b
                       w_aug_ref,     # (2E+2, H)   [W_ih_e; W_ih_d; b_e; b_d]
                       enc_mask_ref,  # (T_in*B, H) f32, 1.0 = valid step
                       w_hh_e_ref,    # (H, H)
                       w_hh_d_ref,    # (H, H)
                       w_ro_ref,      # (H, V_PAD)  zero-padded past VOCAB_SIZE
                       b_ro_ref,      # (1, V_PAD)
                       logits_ref,    # (T_dec*B, V_PAD) f32 output
                       h_all_scr,     # (T_dec*B, H) VMEM scratch
                       *, batch, t_in, t_dec):
    B = batch
    H = w_hh_e_ref.shape[0]
    n_enc = t_in * B

    w_hh_e = w_hh_e_ref[...]
    w_hh_d = w_hh_d_ref[...]

    # Single fused, time-parallel projection for encoder + decoder inputs,
    # with the combined (b_ih + b_hh) biases folded in via the augmented
    # "ones" columns.  Everything left in the recurrence is h @ W_hh.
    proj = jnp.dot(x_aug_ref[...], w_aug_ref[...],
                   preferred_element_type=jnp.float32)
    enc_proj = proj[:n_enc]            # (T_in*B, H)
    dec_proj = proj[n_enc:]            # (T_dec*B, H)
    enc_mask = enc_mask_ref[...]       # (T_in*B, H), already lane-broadcast

    # ---- encoder: only the recurrent matmul stays on the serial chain.
    # State freezes once t >= sequence length (pack_padded_sequence final h).
    h = jnp.zeros((B, H), dtype=jnp.float32)
    for t in range(t_in):                                   # static, unrolled
        pre = enc_proj[t * B:(t + 1) * B]
        m = enc_mask[t * B:(t + 1) * B]                     # (B, H)
        h_new = jnp.tanh(
            pre + jnp.dot(h, w_hh_e, preferred_element_type=jnp.float32))
        h = jnp.where(m > 0.0, h_new, h)                    # pure VPU select

    # ---- decoder: teacher forcing; stack hidden states for batched readout.
    for t in range(t_dec):                                  # static, unrolled
        h = jnp.tanh(
            dec_proj[t * B:(t + 1) * B]
            + jnp.dot(h, w_hh_d, preferred_element_type=jnp.float32))
        h_all_scr[t * B:(t + 1) * B, :] = h

    # Batched, lane-dense readout: one matmul + one contiguous store.
    logits_ref[...] = (jnp.dot(h_all_scr[...], w_ro_ref[...],
                               preferred_element_type=jnp.float32)
                       + b_ro_ref[...])


# ---------------------------------------------------------------------------
# JAX wrapper (embedding gather, batch/lane padding, layout, pallas_call)
# ---------------------------------------------------------------------------
def seq2seq_rnn_forward(params, input_seq, output_seq):
    B, T_in = input_seq.shape
    T_dec = output_seq.shape[1] - 1
    H, E, V = HIDDEN_SIZE, EMBEDDING_SIZE, VOCAB_SIZE

    # pad batch up to a full sublane group (multiple of 8); extra rows are
    # all-padding and get sliced away afterwards.
    B_pad = max(8, ((B + 7) // 8) * 8)
    pad_rows = B_pad - B
    input_p = jnp.concatenate(
        [input_seq,
         jnp.full((pad_rows, T_in), PADDING_IDX, input_seq.dtype)], axis=0)
    output_p = jnp.concatenate(
        [output_seq,
         jnp.full((pad_rows, output_seq.shape[1]), PADDING_IDX,
                  output_seq.dtype)], axis=0)

    emb = params["embedding"]
    enc_emb = emb[input_p]                    # (B_pad, T_in, E)
    dec_emb = emb[output_p[:, :-1]]           # (B_pad, T_dec, E)

    lens = jnp.sum(input_p != PADDING_IDX, axis=-1)                 # (B_pad,)
    enc_mask = (jnp.arange(T_in)[None, :] < lens[:, None]).astype(jnp.float32)

    # time-major, flattened (t*B + b, feature) layout
    enc_emb_tm = jnp.transpose(enc_emb, (1, 0, 2)).reshape(T_in * B_pad, E)
    dec_emb_tm = jnp.transpose(dec_emb, (1, 0, 2)).reshape(T_dec * B_pad, E)
    # mask pre-broadcast to H lanes (keeps the in-loop select broadcast-free)
    enc_mask_tm = jnp.broadcast_to(
        jnp.transpose(enc_mask, (1, 0)).reshape(T_in * B_pad, 1),
        (T_in * B_pad, H)).astype(jnp.float32)

    # weights pre-transposed to [in, out]; RNN biases combined
    w_ih_e = params["enc_w_ih"].T                                   # (E, H)
    w_hh_e = params["enc_w_hh"].T                                   # (H, H)
    b_e = (params["enc_b_ih"] + params["enc_b_hh"])[None, :]        # (1, H)
    w_ih_d = params["dec_w_ih"].T
    w_hh_d = params["dec_w_hh"].T
    b_d = (params["dec_b_ih"] + params["dec_b_hh"])[None, :]

    # block-diagonal augmented input + stacked projection weight:
    #   enc rows: [enc_emb | 0 | 1 | 0]        dec rows: [0 | dec_emb | 0 | 1]
    #   w_aug   : [W_ih_e ; W_ih_d ; b_e ; b_d]
    n_enc, n_dec = T_in * B_pad, T_dec * B_pad
    E2 = 2 * E + 2
    x_aug = jnp.zeros((n_enc + n_dec, E2), jnp.float32)
    x_aug = x_aug.at[:n_enc, :E].set(enc_emb_tm)
    x_aug = x_aug.at[:n_enc, 2 * E].set(1.0)
    x_aug = x_aug.at[n_enc:, E:2 * E].set(dec_emb_tm)
    x_aug = x_aug.at[n_enc:, 2 * E + 1].set(1.0)
    w_aug = jnp.concatenate([w_ih_e, w_ih_d, b_e, b_d], axis=0)     # (2E+2, H)

    # lane-dense readout (pad V=6 up to 128 lanes with zeros)
    w_ro = jnp.zeros((H, V_PAD), jnp.float32).at[:, :V].set(params["ro_w"].T)
    b_ro = jnp.zeros((1, V_PAD), jnp.float32).at[0, :V].set(params["ro_b"])

    vmem = pl.BlockSpec(memory_space=pltpu.MemorySpace.VMEM)
    logits_flat = pl.pallas_call(
        functools.partial(seq2seq_rnn_kernel,
                          batch=B_pad, t_in=T_in, t_dec=T_dec),
        out_shape=jax.ShapeDtypeStruct((T_dec * B_pad, V_PAD), jnp.float32),
        in_specs=[vmem] * 7,
        out_specs=vmem,
        scratch_shapes=[pltpu.VMEM((T_dec * B_pad, H), jnp.float32)],
    )(x_aug, w_aug, enc_mask_tm, w_hh_e, w_hh_d, w_ro, b_ro)

    logits = jnp.transpose(logits_flat.reshape(T_dec, B_pad, V_PAD), (1, 0, 2))
    return logits[:B, :, :V]                                        # (B, T_dec, V)


# ---------------------------------------------------------------------------
# Deterministic parameter init (shapes match the torch module's __init__)
# ---------------------------------------------------------------------------
def init_params(key):
    ks = jax.random.split(key, 10)
    s = 1.0 / np.sqrt(HIDDEN_SIZE)

    def u(k, shape):
        return jax.random.uniform(k, shape, jnp.float32, -s, s)

    return dict(
        embedding=jax.random.normal(ks[0], (VOCAB_SIZE, EMBEDDING_SIZE),
                                    jnp.float32),
        enc_w_ih=u(ks[1], (HIDDEN_SIZE, EMBEDDING_SIZE)),
        enc_w_hh=u(ks[2], (HIDDEN_SIZE, HIDDEN_SIZE)),
        enc_b_ih=u(ks[3], (HIDDEN_SIZE,)),
        enc_b_hh=u(ks[4], (HIDDEN_SIZE,)),
        dec_w_ih=u(ks[5], (HIDDEN_SIZE, EMBEDDING_SIZE)),
        dec_w_hh=u(ks[6], (HIDDEN_SIZE, HIDDEN_SIZE)),
        dec_b_ih=u(ks[7], (HIDDEN_SIZE,)),
        dec_b_hh=u(ks[8], (HIDDEN_SIZE,)),
        ro_w=u(ks[9], (VOCAB_SIZE, HIDDEN_SIZE)),
        ro_b=jnp.zeros((VOCAB_SIZE,), jnp.float32),
    )


# ---------------------------------------------------------------------------
# Pure numpy reference (mirrors torch nn.RNN semantics) for a sanity check
# ---------------------------------------------------------------------------
def ref_forward(params, input_seq, output_seq):
    p = {k: np.asarray(v) for k, v in params.items()}
    input_seq = np.asarray(input_seq)
    output_seq = np.asarray(output_seq)
    H = HIDDEN_SIZE

    def step(x, h, w_ih, w_hh, b_ih, b_hh):
        return np.tanh(x @ w_ih.T + b_ih + h @ w_hh.T + b_hh)

    B, T_in = input_seq.shape
    T_dec = output_seq.shape[1] - 1
    logits = np.zeros((B, T_dec, VOCAB_SIZE), np.float32)
    for b in range(B):
        h = np.zeros(H, np.float32)
        length = int(np.sum(input_seq[b] != PADDING_IDX))
        for t in range(length):
            x = p["embedding"][input_seq[b, t]]
            h = step(x, h, p["enc_w_ih"], p["enc_w_hh"],
                     p["enc_b_ih"], p["enc_b_hh"])
        for t in range(T_dec):
            x = p["embedding"][output_seq[b, t]]
            h = step(x, h, p["dec_w_ih"], p["dec_w_hh"],
                     p["dec_b_ih"], p["dec_b_hh"])
            logits[b, t] = h @ p["ro_w"].T + p["ro_b"]
    return logits


if __name__ == "__main__":
    key = jax.random.PRNGKey(0)
    params = init_params(key)

    # batch=2, input seq len=8, output seq len=8 (decoder sees 7 steps);
    # non-padding tokens form a prefix, as pack_padded_sequence assumes.
    input_seq = jnp.array([[0, 1, 2, 5, 3, 4, 4, 4],
                           [2, 2, 1, 0, 5, 3, 4, 4]], dtype=jnp.int32)
    output_seq = jnp.array([[3, 1, 2, 0, 3, 4, 4, 4],
                            [3, 5, 0, 1, 2, 3, 4, 4]], dtype=jnp.int32)

    logits = seq2seq_rnn_forward(params, input_seq, output_seq)
    logits = jax.block_until_ready(logits)

    # final masking — dynamic-shape glue done outside the kernel, like
    # torch's logits[mask] / targets[mask].
    # TODO(synk): boolean masking produces data-dependent shapes; kept in host code.
    targets = np.asarray(output_seq[:, 1:])
    mask = targets != PADDING_IDX
    masked_logits = np.asarray(logits)[mask]       # (N_valid, V)
    masked_targets = targets[mask]                 # (N_valid,)

    # sanity check against the pure numpy nn.RNN reference
    ref = ref_forward(params, input_seq, output_seq)
    np.testing.assert_allclose(np.asarray(logits), ref, rtol=2e-3, atol=2e-3)
    assert masked_logits.shape == (int(mask.sum()), VOCAB_SIZE)
    assert masked_targets.shape == (int(mask.sum()),)

    print("KERNEL_OK")
</pallas_src>

<mosaic_0001>
module attributes {stable_mosaic.version = 11 : i64} {
  func.func @seq2seq_rnn_kernel(%arg0: memref<120x12xf32, #tpu.memory_space<vmem>>, %arg1: memref<12x32xf32, #tpu.memory_space<vmem>>, %arg2: memref<64x32xf32, #tpu.memory_space<vmem>>, %arg3: memref<32x32xf32, #tpu.memory_space<vmem>>, %arg4: memref<32x32xf32, #tpu.memory_space<vmem>>, %arg5: memref<32x128xf32, #tpu.memory_space<vmem>>, %arg6: memref<1x128xf32, #tpu.memory_space<vmem>>, %arg7: memref<56x128xf32, #tpu.memory_space<vmem>>, %arg8: memref<56x32xf32, #tpu.memory_space<vmem>>) attributes {dimension_semantics = [], scalar_prefetch = 0 : i64, scratch_operands = 1 : i64, tpu.core_type = #tpu.core_type<tc>} {
    %c0 = arith.constant 0 : index
    %c0_0 = arith.constant 0 : index
    %0 = vector.load %arg3[%c0, %c0_0] : memref<32x32xf32, #tpu.memory_space<vmem>>, vector<32x32xf32>
    %c0_1 = arith.constant 0 : index
    %c0_2 = arith.constant 0 : index
    %1 = vector.load %arg4[%c0_1, %c0_2] : memref<32x32xf32, #tpu.memory_space<vmem>>, vector<32x32xf32>
    %c0_3 = arith.constant 0 : index
    %c0_4 = arith.constant 0 : index
    %2 = vector.load %arg0[%c0_3, %c0_4] : memref<120x12xf32, #tpu.memory_space<vmem>>, vector<120x12xf32>
    %c0_5 = arith.constant 0 : index
    %c0_6 = arith.constant 0 : index
    %3 = vector.load %arg1[%c0_5, %c0_6] : memref<12x32xf32, #tpu.memory_space<vmem>>, vector<12x32xf32>
    %cst = arith.constant dense<0.000000e+00> : vector<120x32xf32>
    %4 = tpu.matmul %2, %3, %cst {dimension_numbers = #tpu.dot_dimension_numbers<[1], [0], [0], [1], [0, 0, 1, 1], [], []>} : vector<120x12xf32>, vector<12x32xf32>, vector<120x32xf32> -> vector<120x32xf32>
    %5 = vector.extract_strided_slice %4 {offsets = [0, 0], sizes = [64, 32], strides = [1, 1]} : vector<120x32xf32> to vector<64x32xf32>
    %6 = vector.extract_strided_slice %4 {offsets = [64, 0], sizes = [56, 32], strides = [1, 1]} : vector<120x32xf32> to vector<56x32xf32>
    %c0_7 = arith.constant 0 : index
    %c0_8 = arith.constant 0 : index
    %7 = vector.load %arg2[%c0_7, %c0_8] : memref<64x32xf32, #tpu.memory_space<vmem>>, vector<64x32xf32>
    %cst_9 = arith.constant 0.000000e+00 : f32
    %8 = vector.broadcast %cst_9 : f32 to vector<8x32xf32>
    %9 = vector.extract_strided_slice %5 {offsets = [0, 0], sizes = [8, 32], strides = [1, 1]} : vector<64x32xf32> to vector<8x32xf32>
    %10 = vector.extract_strided_slice %7 {offsets = [0, 0], sizes = [8, 32], strides = [1, 1]} : vector<64x32xf32> to vector<8x32xf32>
    %cst_10 = arith.constant dense<0.000000e+00> : vector<8x32xf32>
    %11 = tpu.matmul %8, %0, %cst_10 {dimension_numbers = #tpu.dot_dimension_numbers<[1], [0], [0], [1], [0, 0, 1, 1], [], []>} : vector<8x32xf32>, vector<32x32xf32>, vector<8x32xf32> -> vector<8x32xf32>
    %12 = arith.addf %9, %11 : vector<8x32xf32>
    %13 = math.tanh %12 : vector<8x32xf32>
    %cst_11 = arith.constant 0.000000e+00 : f32
    %14 = vector.broadcast %cst_11 : f32 to vector<8x32xf32>
    %15 = arith.cmpf ogt, %10, %14 : vector<8x32xf32>
    %16 = arith.select %15, %13, %8 : vector<8x32xi1>, vector<8x32xf32>
    %17 = vector.extract_strided_slice %5 {offsets = [8, 0], sizes = [8, 32], strides = [1, 1]} : vector<64x32xf32> to vector<8x32xf32>
    %18 = vector.extract_strided_slice %7 {offsets = [8, 0], sizes = [8, 32], strides = [1, 1]} : vector<64x32xf32> to vector<8x32xf32>
    %cst_12 = arith.constant dense<0.000000e+00> : vector<8x32xf32>
    %19 = tpu.matmul %16, %0, %cst_12 {dimension_numbers = #tpu.dot_dimension_numbers<[1], [0], [0], [1], [0, 0, 1, 1], [], []>} : vector<8x32xf32>, vector<32x32xf32>, vector<8x32xf32> -> vector<8x32xf32>
    %20 = arith.addf %17, %19 : vector<8x32xf32>
    %21 = math.tanh %20 : vector<8x32xf32>
    %cst_13 = arith.constant 0.000000e+00 : f32
    %22 = vector.broadcast %cst_13 : f32 to vector<8x32xf32>
    %23 = arith.cmpf ogt, %18, %22 : vector<8x32xf32>
    %24 = arith.select %23, %21, %16 : vector<8x32xi1>, vector<8x32xf32>
    %25 = vector.extract_strided_slice %5 {offsets = [16, 0], sizes = [8, 32], strides = [1, 1]} : vector<64x32xf32> to vector<8x32xf32>
    %26 = vector.extract_strided_slice %7 {offsets = [16, 0], sizes = [8, 32], strides = [1, 1]} : vector<64x32xf32> to vector<8x32xf32>
    %cst_14 = arith.constant dense<0.000000e+00> : vector<8x32xf32>
    %27 = tpu.matmul %24, %0, %cst_14 {dimension_numbers = #tpu.dot_dimension_numbers<[1], [0], [0], [1], [0, 0, 1, 1], [], []>} : vector<8x32xf32>, vector<32x32xf32>, vector<8x32xf32> -> vector<8x32xf32>
    %28 = arith.addf %25, %27 : vector<8x32xf32>
    %29 = math.tanh %28 : vector<8x32xf32>
    %cst_15 = arith.constant 0.000000e+00 : f32
    %30 = vector.broadcast %cst_15 : f32 to vector<8x32xf32>
    %31 = arith.cmpf ogt, %26, %30 : vector<8x32xf32>
    %32 = arith.select %31, %29, %24 : vector<8x32xi1>, vector<8x32xf32>
    %33 = vector.extract_strided_slice %5 {offsets = [24, 0], sizes = [8, 32], strides = [1, 1]} : vector<64x32xf32> to vector<8x32xf32>
    %34 = vector.extract_strided_slice %7 {offsets = [24, 0], sizes = [8, 32], strides = [1, 1]} : vector<64x32xf32> to vector<8x32xf32>
    %cst_16 = arith.constant dense<0.000000e+00> : vector<8x32xf32>
    %35 = tpu.matmul %32, %0, %cst_16 {dimension_numbers = #tpu.dot_dimension_numbers<[1], [0], [0], [1], [0, 0, 1, 1], [], []>} : vector<8x32xf32>, vector<32x32xf32>, vector<8x32xf32> -> vector<8x32xf32>
    %36 = arith.addf %33, %35 : vector<8x32xf32>
    %37 = math.tanh %36 : vector<8x32xf32>
    %cst_17 = arith.constant 0.000000e+00 : f32
    %38 = vector.broadcast %cst_17 : f32 to vector<8x32xf32>
    %39 = arith.cmpf ogt, %34, %38 : vector<8x32xf32>
    %40 = arith.select %39, %37, %32 : vector<8x32xi1>, vector<8x32xf32>
    %41 = vector.extract_strided_slice %5 {offsets = [32, 0], sizes = [8, 32], strides = [1, 1]} : vector<64x32xf32> to vector<8x32xf32>
    %42 = vector.extract_strided_slice %7 {offsets = [32, 0], sizes = [8, 32], strides = [1, 1]} : vector<64x32xf32> to vector<8x32xf32>
    %cst_18 = arith.constant dense<0.000000e+00> : vector<8x32xf32>
    %43 = tpu.matmul %40, %0, %cst_18 {dimension_numbers = #tpu.dot_dimension_numbers<[1], [0], [0], [1], [0, 0, 1, 1], [], []>} : vector<8x32xf32>, vector<32x32xf32>, vector<8x32xf32> -> vector<8x32xf32>
    %44 = arith.addf %41, %43 : vector<8x32xf32>
    %45 = math.tanh %44 : vector<8x32xf32>
    %cst_19 = arith.constant 0.000000e+00 : f32
    %46 = vector.broadcast %cst_19 : f32 to vector<8x32xf32>
    %47 = arith.cmpf ogt, %42, %46 : vector<8x32xf32>
    %48 = arith.select %47, %45, %40 : vector<8x32xi1>, vector<8x32xf32>
    %49 = vector.extract_strided_slice %5 {offsets = [40, 0], sizes = [8, 32], strides = [1, 1]} : vector<64x32xf32> to vector<8x32xf32>
    %50 = vector.extract_strided_slice %7 {offsets = [40, 0], sizes = [8, 32], strides = [1, 1]} : vector<64x32xf32> to vector<8x32xf32>
    %cst_20 = arith.constant dense<0.000000e+00> : vector<8x32xf32>
    %51 = tpu.matmul %48, %0, %cst_20 {dimension_numbers = #tpu.dot_dimension_numbers<[1], [0], [0], [1], [0, 0, 1, 1], [], []>} : vector<8x32xf32>, vector<32x32xf32>, vector<8x32xf32> -> vector<8x32xf32>
    %52 = arith.addf %49, %51 : vector<8x32xf32>
    %53 = math.tanh %52 : vector<8x32xf32>
    %cst_21 = arith.constant 0.000000e+00 : f32
    %54 = vector.broadcast %cst_21 : f32 to vector<8x32xf32>
    %55 = arith.cmpf ogt, %50, %54 : vector<8x32xf32>
    %56 = arith.select %55, %53, %48 : vector<8x32xi1>, vector<8x32xf32>
    %57 = vector.extract_strided_slice %5 {offsets = [48, 0], sizes = [8, 32], strides = [1, 1]} : vector<64x32xf32> to vector<8x32xf32>
    %58 = vector.extract_strided_slice %7 {offsets = [48, 0], sizes = [8, 32], strides = [1, 1]} : vector<64x32xf32> to vector<8x32xf32>
    %cst_22 = arith.constant dense<0.000000e+00> : vector<8x32xf32>
    %59 = tpu.matmul %56, %0, %cst_22 {dimension_numbers = #tpu.dot_dimension_numbers<[1], [0], [0], [1], [0, 0, 1, 1], [], []>} : vector<8x32xf32>, vector<32x32xf32>, vector<8x32xf32> -> vector<8x32xf32>
    %60 = arith.addf %57, %59 : vector<8x32xf32>
    %61 = math.tanh %60 : vector<8x32xf32>
    %cst_23 = arith.constant 0.000000e+00 : f32
    %62 = vector.broadcast %cst_23 : f32 to vector<8x32xf32>
    %63 = arith.cmpf ogt, %58, %62 : vector<8x32xf32>
    %64 = arith.select %63, %61, %56 : vector<8x32xi1>, vector<8x32xf32>
    %65 = vector.extract_strided_slice %5 {offsets = [56, 0], sizes = [8, 32], strides = [1, 1]} : vector<64x32xf32> to vector<8x32xf32>
    %66 = vector.extract_strided_slice %7 {offsets = [56, 0], sizes = [8, 32], strides = [1, 1]} : vector<64x32xf32> to vector<8x32xf32>
    %cst_24 = arith.constant dense<0.000000e+00> : vector<8x32xf32>
    %67 = tpu.matmul %64, %0, %cst_24 {dimension_numbers = #tpu.dot_dimension_numbers<[1], [0], [0], [1], [0, 0, 1, 1], [], []>} : vector<8x32xf32>, vector<32x32xf32>, vector<8x32xf32> -> vector<8x32xf32>
    %68 = arith.addf %65, %67 : vector<8x32xf32>
    %69 = math.tanh %68 : vector<8x32xf32>
    %cst_25 = arith.constant 0.000000e+00 : f32
    %70 = vector.broadcast %cst_25 : f32 to vector<8x32xf32>
    %71 = arith.cmpf ogt, %66, %70 : vector<8x32xf32>
    %72 = arith.select %71, %69, %64 : vector<8x32xi1>, vector<8x32xf32>
    %73 = vector.extract_strided_slice %6 {offsets = [0, 0], sizes = [8, 32], strides = [1, 1]} : vector<56x32xf32> to vector<8x32xf32>
    %cst_26 = arith.constant dense<0.000000e+00> : vector<8x32xf32>
    %74 = tpu.matmul %72, %1, %cst_26 {dimension_numbers = #tpu.dot_dimension_numbers<[1], [0], [0], [1], [0, 0, 1, 1], [], []>} : vector<8x32xf32>, vector<32x32xf32>, vector<8x32xf32> -> vector<8x32xf32>
    %75 = arith.addf %73, %74 : vector<8x32xf32>
    %76 = math.tanh %75 : vector<8x32xf32>
    %c0_27 = arith.constant 0 : index
    %c0_28 = arith.constant 0 : index
    %77 = vector.load %arg8[%c0_27, %c0_28] : memref<56x32xf32, #tpu.memory_space<vmem>>, vector<8x32xf32>
    tpu.vector_store %arg8[%c0_27, %c0_28], %76 {strides = array<i32>} : memref<56x32xf32, #tpu.memory_space<vmem>>, vector<8x32xf32>,
    %78 = vector.extract_strided_slice %6 {offsets = [8, 0], sizes = [8, 32], strides = [1, 1]} : vector<56x32xf32> to vector<8x32xf32>
    %cst_29 = arith.constant dense<0.000000e+00> : vector<8x32xf32>
    %79 = tpu.matmul %76, %1, %cst_29 {dimension_numbers = #tpu.dot_dimension_numbers<[1], [0], [0], [1], [0, 0, 1, 1], [], []>} : vector<8x32xf32>, vector<32x32xf32>, vector<8x32xf32> -> vector<8x32xf32>
    %80 = arith.addf %78, %79 : vector<8x32xf32>
    %81 = math.tanh %80 : vector<8x32xf32>
    %c8 = arith.constant 8 : index
    %c0_30 = arith.constant 0 : index
    %82 = vector.load %arg8[%c8, %c0_30] : memref<56x32xf32, #tpu.memory_space<vmem>>, vector<8x32xf32>
    tpu.vector_store %arg8[%c8, %c0_30], %81 {strides = array<i32>} : memref<56x32xf32, #tpu.memory_space<vmem>>, vector<8x32xf32>,
    %83 = vector.extract_strided_slice %6 {offsets = [16, 0], sizes = [8, 32], strides = [1, 1]} : vector<56x32xf32> to vector<8x32xf32>
    %cst_31 = arith.constant dense<0.000000e+00> : vector<8x32xf32>
    %84 = tpu.matmul %81, %1, %cst_31 {dimension_numbers = #tpu.dot_dimension_numbers<[1], [0], [0], [1], [0, 0, 1, 1], [], []>} : vector<8x32xf32>, vector<32x32xf32>, vector<8x32xf32> -> vector<8x32xf32>
    %85 = arith.addf %83, %84 : vector<8x32xf32>
    %86 = math.tanh %85 : vector<8x32xf32>
    %c16 = arith.constant 16 : index
    %c0_32 = arith.constant 0 : index
    %87 = vector.load %arg8[%c16, %c0_32] : memref<56x32xf32, #tpu.memory_space<vmem>>, vector<8x32xf32>
    tpu.vector_store %arg8[%c16, %c0_32], %86 {strides = array<i32>} : memref<56x32xf32, #tpu.memory_space<vmem>>, vector<8x32xf32>,
    %88 = vector.extract_strided_slice %6 {offsets = [24, 0], sizes = [8, 32], strides = [1, 1]} : vector<56x32xf32> to vector<8x32xf32>
    %cst_33 = arith.constant dense<0.000000e+00> : vector<8x32xf32>
    %89 = tpu.matmul %86, %1, %cst_33 {dimension_numbers = #tpu.dot_dimension_numbers<[1], [0], [0], [1], [0, 0, 1, 1], [], []>} : vector<8x32xf32>, vector<32x32xf32>, vector<8x32xf32> -> vector<8x32xf32>
    %90 = arith.addf %88, %89 : vector<8x32xf32>
    %91 = math.tanh %90 : vector<8x32xf32>
    %c24 = arith.constant 24 : index
    %c0_34 = arith.constant 0 : index
    %92 = vector.load %arg8[%c24, %c0_34] : memref<56x32xf32, #tpu.memory_space<vmem>>, vector<8x32xf32>
    tpu.vector_store %arg8[%c24, %c0_34], %91 {strides = array<i32>} : memref<56x32xf32, #tpu.memory_space<vmem>>, vector<8x32xf32>,
    %93 = vector.extract_strided_slice %6 {offsets = [32, 0], sizes = [8, 32], strides = [1, 1]} : vector<56x32xf32> to vector<8x32xf32>
    %cst_35 = arith.constant dense<0.000000e+00> : vector<8x32xf32>
    %94 = tpu.matmul %91, %1, %cst_35 {dimension_numbers = #tpu.dot_dimension_numbers<[1], [0], [0], [1], [0, 0, 1, 1], [], []>} : vector<8x32xf32>, vector<32x32xf32>, vector<8x32xf32> -> vector<8x32xf32>
    %95 = arith.addf %93, %94 : vector<8x32xf32>
    %96 = math.tanh %95 : vector<8x32xf32>
    %c32 = arith.constant 32 : index
    %c0_36 = arith.constant 0 : index
    %97 = vector.load %arg8[%c32, %c0_36] : memref<56x32xf32, #tpu.memory_space<vmem>>, vector<8x32xf32>
    tpu.vector_store %arg8[%c32, %c0_36], %96 {strides = array<i32>} : memref<56x32xf32, #tpu.memory_space<vmem>>, vector<8x32xf32>,
    %98 = vector.extract_strided_slice %6 {offsets = [40, 0], sizes = [8, 32], strides = [1, 1]} : vector<56x32xf32> to vector<8x32xf32>
    %cst_37 = arith.constant dense<0.000000e+00> : vector<8x32xf32>
    %99 = tpu.matmul %96, %1, %cst_37 {dimension_numbers = #tpu.dot_dimension_numbers<[1], [0], [0], [1], [0, 0, 1, 1], [], []>} : vector<8x32xf32>, vector<32x32xf32>, vector<8x32xf32> -> vector<8x32xf32>
    %100 = arith.addf %98, %99 : vector<8x32xf32>
    %101 = math.tanh %100 : vector<8x32xf32>
    %c40 = arith.constant 40 : index
    %c0_38 = arith.constant 0 : index
    %102 = vector.load %arg8[%c40, %c0_38] : memref<56x32xf32, #tpu.memory_space<vmem>>, vector<8x32xf32>
    tpu.vector_store %arg8[%c40, %c0_38], %101 {strides = array<i32>} : memref<56x32xf32, #tpu.memory_space<vmem>>, vector<8x32xf32>,
    %103 = vector.extract_strided_slice %6 {offsets = [48, 0], sizes = [8, 32], strides = [1, 1]} : vector<56x32xf32> to vector<8x32xf32>
    %cst_39 = arith.constant dense<0.000000e+00> : vector<8x32xf32>
    %104 = tpu.matmul %101, %1, %cst_39 {dimension_numbers = #tpu.dot_dimension_numbers<[1], [0], [0], [1], [0, 0, 1, 1], [], []>} : vector<8x32xf32>, vector<32x32xf32>, vector<8x32xf32> -> vector<8x32xf32>
    %105 = arith.addf %103, %104 : vector<8x32xf32>
    %106 = math.tanh %105 : vector<8x32xf32>
    %c48 = arith.constant 48 : index
    %c0_40 = arith.constant 0 : index
    %107 = vector.load %arg8[%c48, %c0_40] : memref<56x32xf32, #tpu.memory_space<vmem>>, vector<8x32xf32>
    tpu.vector_store %arg8[%c48, %c0_40], %106 {strides = array<i32>} : memref<56x32xf32, #tpu.memory_space<vmem>>, vector<8x32xf32>,
    %c0_41 = arith.constant 0 : index
    %c0_42 = arith.constant 0 : index
    %108 = vector.load %arg8[%c0_41, %c0_42] : memref<56x32xf32, #tpu.memory_space<vmem>>, vector<56x32xf32>
    %c0_43 = arith.constant 0 : index
    %c0_44 = arith.constant 0 : index
    %109 = vector.load %arg5[%c0_43, %c0_44] : memref<32x128xf32, #tpu.memory_space<vmem>>, vector<32x128xf32>
    %cst_45 = arith.constant dense<0.000000e+00> : vector<56x128xf32>
    %110 = tpu.matmul %108, %109, %cst_45 {dimension_numbers = #tpu.dot_dimension_numbers<[1], [0], [0], [1], [0, 0, 1, 1], [], []>} : vector<56x32xf32>, vector<32x128xf32>, vector<56x128xf32> -> vector<56x128xf32>
    %c0_46 = arith.constant 0 : index
    %c0_47 = arith.constant 0 : index
    %111 = vector.load %arg6[%c0_46, %c0_47] : memref<1x128xf32, #tpu.memory_space<vmem>>, vector<1x128xf32>
    %112 = vector.broadcast %111 : vector<1x128xf32> to vector<56x128xf32>
    %113 = arith.addf %110, %112 : vector<56x128xf32>
    %c0_48 = arith.constant 0 : index
    %c0_49 = arith.constant 0 : index
    %114 = vector.load %arg7[%c0_48, %c0_49] : memref<56x128xf32, #tpu.memory_space<vmem>>, vector<56x128xf32>
    tpu.vector_store %arg7[%c0_48, %c0_49], %113 {strides = array<i32>} : memref<56x128xf32, #tpu.memory_space<vmem>>, vector<56x128xf32>,
    return
  }
}

</mosaic_0001>

<bundles_post_ra>
// kernel: tpu_custom_call.1
= control target key start
LH: loop header
LB: loop body
LE: loop exit
PB: predicated region body
PF: predicated region fallthrough
CT: control target
= control target key end

     0   :  { %vm98_vm0 = vcmask 1043456   ;;  %v2006_v1 = vmov 0.0   ;;  %vm2007_vm1 = vmmov 0   ;;  %vm52_vm2 = vcmask 97280   ;;  %s2445_s0 = inlined_call_operand.vmem [shape: f32[120,12], index: 0, kind: input, shape index: {}]   ;;  %s2446_s1 = inlined_call_operand.vmem [shape: f32[12,32], index: 1, kind: input, shape index: {}]   ;;  %s2447_s2 = inlined_call_operand.vmem [shape: f32[64,32], index: 2, kind: input, shape index: {}]   ;;  %s2448_s3 = inlined_call_operand.vmem [shape: f32[32,32], index: 3, kind: input, shape index: {}]   ;;  %s2449_s4 = inlined_call_operand.vmem [shape: f32[32,32], index: 4, kind: input, shape index: {}]   ;;  %s2450_s5 = inlined_call_operand.vmem [shape: f32[32,128], index: 5, kind: input, shape index: {}]   ;;  %s2451_s6 = inlined_call_operand.vmem [shape: f32[1,128], index: 6, kind: input, shape index: {}]   ;;  %s2452_s7 = inlined_call_operand.hbm [shape: f32[56,128], index: 7, kind: output, shape index: {}]  }
   0x1   :  { %v51_v0 = vld [vmem:[%s2446_s1 + $0x8] sm:$0xf]  ;;  %1945 = vmatprep.subr.mxu1 %v2006_v1  ;;  %v50_v2 = vld [vmem:[%s2446_s1] sm:$0xff]  ;;  %1739 = vmatprep.mubr.msk.f32.mxu1 %vm2007_vm1, %v2006_v1  ;;  %v46_v3 = vld [vmem:[%s2445_s0 + $0x58] sm:$0xff] }
   0x2   :  { %1947 = vmatpush3.msk.msra.mxu1 %vm98_vm0, %v51_v0  ;;  %1702 = vmatprep.subr.mxu0 %v2006_v1  ;;  %v2068_v4 = vld [vmem:[%s2448_s3 + $0x18] sm:$0xff] }
   0x3   :  { %1946 = vmatprep.subr.mxu1 %v2006_v1  ;;  %1703 = vmatpush3.msk.msra.mxu0 %vm98_vm0, %v51_v0 }
   0x4   :  { %1948 = vmatpush3.msra.mxu1 %v50_v2  ;;  %1704 = vmatprep.subr.mxu0 %v2006_v1 }
   0x5   :  { %12 = vsyncpa [#allocation4], 0  ;;  %1740 = vmatmul.mubr.msk.f32.vlgmr.msra.gmra.mxu1 %vm52_vm2, %v46_v3  ;;  %1751 = vmatprep.subr.mxu1 %v2006_v1  ;;  %v2076_v5 = vld [vmem:[%s2448_s3 + $0x10] sm:$0xff]  ;;  %v47_v6 = vld [vmem:[%s2445_s0 + $0x60] sm:$0xff]  ;;  %vm250_vm4 = vcmask 261120  }
   0x6   :  { %1752 = vmatpush3.msra.mxu1 %v2068_v4  ;;  %1742 = vmatprep.mubr.msk.f32.mxu1 %vm2007_vm1, %v2006_v1  ;;  %v2088_v7 = vld [vmem:[%s2448_s3 + $0x8] sm:$0xff]  ;;  %v35_v8 = vld [vmem:[%s2445_s0] sm:$0xff]  ;;  %v49_v11 = vld [vmem:[%s2445_s0 + $0x70] sm:$0xff] }
   0x7   :  { %1753 = vmatprep.subr.mxu1 %v2006_v1  ;;  %1705 = vmatpush3.msra.mxu0 %v50_v2  ;;  %v2101_v9 = vld [vmem:[%s2448_s3] sm:$0xff]  ;;  %v48_v10 = vld [vmem:[%s2445_s0 + $0x68] sm:$0xff]  ;;  %v37_v31 = vld [vmem:[%s2445_s0 + $0x10] sm:$0xff] }
   0x8   :  { %1754 = vmatpush3.msra.mxu1 %v2076_v5  ;;  %1706 = vmatprep.mubr.msk.f32.mxu0 %vm2007_vm1, %v2006_v1  ;;  %v36_v12 = vld [vmem:[%s2445_s0 + $0x8] sm:$0xff]  ;;  %v242_v26 = vld [vmem:[%s2447_s2] sm:$0xff]  ;;  %v38_v40 = vld [vmem:[%s2445_s0 + $0x18] sm:$0xff] }
   0x9   :  { %1743 = vmatmul.mubr.msk.f32.gmra.mxu1 %vm52_vm2, %v47_v6  ;;  %1755 = vmatprep.subr.mxu1 %v2006_v1  ;;  %vm326_vm3 = vcmp.gt.f32.partialorder %v242_v26, 0.0  ;;  %v243_v35 = vld [vmem:[%s2447_s2 + $0x8] sm:$0xff]  ;;  %v244_v44 = vld [vmem:[%s2447_s2 + $0x10] sm:$0xff]  ;;  %v39_v49 = vld [vmem:[%s2445_s0 + $0x20] sm:$0xff] }
   0xa   :  { %1745 = vmatprep.mubr.msk.f32.mxu1 %vm2007_vm1, %v2006_v1  ;;  %1756 = vmatpush3.msra.mxu1 %v2088_v7  ;;  %vm403_vm5 = vcmp.gt.f32.partialorder %v243_v35, 0.0  ;;  %vm480_vm6 = vcmp.gt.f32.partialorder %v244_v44, 0.0  ;;  %v245_v53 = vld [vmem:[%s2447_s2 + $0x18] sm:$0xff]  ;;  %v40_v58 = vld [vmem:[%s2445_s0 + $0x28] sm:$0xff]  ;;  %v246_v62 = vld [vmem:[%s2447_s2 + $0x20] sm:$0xff] }
   0xb   :  { %1757 = vmatprep.subr.mxu1 %v2006_v1  ;;  %1707 = vmatmul.mubr.msk.f32.vlgmr.msra.gmra.mxu0 %vm52_vm2, %v35_v8  ;;  %vm557_vm7 = vcmp.gt.f32.partialorder %v245_v53, 0.0  ;;  %vm634_vm8 = vcmp.gt.f32.partialorder %v246_v62, 0.0  ;;  %v247_v8 = vld [vmem:[%s2447_s2 + $0x28] sm:$0xff]  ;;  %v2299_v35 = vld [vmem:[%s2449_s4 + $0x18] sm:$0xff] }
   0xc   :  { %1758 = vmatpush3.msra.mxu1 %v2101_v9  ;;  %1709 = vmatprep.mubr.msk.f32.mxu0 %vm2007_vm1, %v2006_v1  ;;  %vm711_vm9 = vcmp.gt.f32.partialorder %v247_v8, 0.0 }
   0xd   :  { %1746 = vmatmul.mubr.msk.f32.gmra.mxu1 %vm52_vm2, %v48_v10  ;;  %1762 = vmatprep.subr.mxu1 %v2006_v1 }
   0xe   :  { %1748 = vmatprep.mubr.msk.f32.mxu1 %vm2007_vm1, %v2006_v1  ;;  %1828 = vmatprep.subr.mxu0 %v2006_v1 }
   0xf   :  { %1829 = vmatpush3.msra.mxu0 %v2068_v4 }
  0x10   :  { %1830 = vmatprep.subr.mxu0 %v2006_v1  ;;  %1710 = vmatmul.mubr.msk.f32.gmra.mxu0 %vm52_vm2, %v36_v12 }
  0x11   :  { %1749 = vmatmul.mubr.msk.f32.gmra.mxu1 %vm52_vm2, %v49_v11  ;;  %1831 = vmatpush3.msra.mxu0 %v2076_v5 }
  0x12   :  { %1759 = vmatprep.mubr.msk.f32.mxu1 %vm2007_vm1, %v2006_v1  ;;  %1832 = vmatprep.subr.mxu0 %v2006_v1 }
  0x13   :  { %1833 = vmatpush3.msra.mxu0 %v2088_v7  ;;  %1712 = vmatprep.mubr.msk.f32.mxu0 %vm2007_vm1, %v2006_v1 }
  0x14   :  { %1834 = vmatprep.subr.mxu0 %v2006_v1  ;;  %1713 = vmatmul.mubr.msk.f32.gmra.mxu0 %vm52_vm2, %v37_v31 }
  0x15   :  { %1760 = vmatmul.mubr.f32.vlgmr.msra.gmra.mxu1 %v2006_v1  ;;  %1835 = vmatpush3.msra.mxu0 %v2101_v9 }
  0x16   :  { %1763 = vmatpush3.msra.mxu1 %v2068_v4  ;;  %1770 = vmatprep.mubr.msk.f32.mxu1 %vm2007_vm1, %v2006_v1 }
  0x17   :  { %1764 = vmatprep.subr.mxu1 %v2006_v1  ;;  %1850 = vmatprep.subr.mxu0 %v2006_v1 }
  0x18   :  { %1765 = vmatpush3.msra.mxu1 %v2076_v5  ;;  %1715 = vmatprep.mubr.msk.f32.mxu0 %vm2007_vm1, %v2006_v1 }
  0x19   :  { %1766 = vmatprep.subr.mxu1 %v2006_v1  ;;  %1716 = vmatmul.mubr.msk.f32.gmra.mxu0 %vm52_vm2, %v38_v40 }
  0x1a   :  { %1767 = vmatpush3.msra.mxu1 %v2088_v7  ;;  %1718 = vmatprep.mubr.msk.f32.mxu0 %vm2007_vm1, %v2006_v1 }
  0x1b   :  { %1768 = vmatprep.subr.mxu1 %v2006_v1 }
  0x1c   :  { %1769 = vmatpush3.msra.mxu1 %v2101_v9 }
  0x1d   :  { %1773 = vmatprep.subr.mxu1 %v2006_v1  ;;  %1719 = vmatmul.mubr.msk.f32.gmra.mxu0 %vm52_vm2, %v39_v49 }
  0x1e   :  { %1721 = vmatprep.mubr.msk.f32.mxu0 %vm2007_vm1, %v2006_v1 }
  0x21   :  { %1722 = vmatmul.mubr.msk.f32.gmra.mxu0 %vm52_vm2, %v40_v58 }
  0x22   :  { %1724 = vmatprep.mubr.msk.f32.mxu0 %vm2007_vm1, %v2006_v1 }
  0xc5   :  { %v2150_v13 = vpop.f32.mrf.mxu1 }
  0xc7   :  { %v1741_v14 = vpop.f32.mrf.mxu1 }
  0xc8   :  { %v42_v14 = vld [vmem:[%s2445_s0 + $0x38] sm:$0xff] }
  0xc9   :  { %v2152_v15 = vpop.f32.mrf.mxu1 }
  0xcb   :  { %v1744_v16 = vpop.f32.mrf.mxu1  ;;  %v168_v17 = vpop.f32.mrf.mxu0 }
  0xcc   :  { %v43_v16 = vld [vmem:[%s2445_s0 + $0x40] sm:$0xff] }
  0xcd   :  { %v2154_v18 = vpop.f32.mrf.mxu1  ;;  %v1708_v19 = vpop.f32.mrf.mxu0 }
  0xce   :  { %v45_v19 = vld [vmem:[%s2445_s0 + $0x50] sm:$0xff] }
  0xcf   :  { %v1747_v20 = vpop.f32.mrf.mxu1 }
  0xd0   :  { %v173_v29 = vpop.f32.mrf.mxu0 }
  0xd1   :  { %v2156_v21 = vpop.f32.mrf.mxu1 }
  0xd2   :  { %v1711_v30 = vpop.f32.mrf.mxu0 }
  0xd3   :  { %v1750_v22 = vpop.f32.mrf.mxu1 }
  0xd4   :  { %v178_v38 = vpop.f32.mrf.mxu0 }
  0xd5   :  { %v320_v23 = vpop.f32.mrf.mxu1 }
  0xd6   :  { %v324_v24 = vadd.f32 %v320_v23, %v168_v17  ;;  %v1714_v39 = vpop.f32.mrf.mxu0  ;;  %v44_v17 = vld [vmem:[%s2445_s0 + $0x48] sm:$0xff] }
  0xd7   :  { %v1761_v25 = vpop.f32.mrf.mxu1 }
  0xd8   :  { %1954 = vtanh.f32 %v324_v24  ;;  %v248_v24 = vld [vmem:[%s2447_s2 + $0x30] sm:$0xff] }
  0xd9   :  { %v183_v47 = vpop.f32.mrf.mxu0  ;;  %vm788_vm10 = vcmp.gt.f32.partialorder %v248_v24, 0.0 }
  0xdb   :  { %v1717_v48 = vpop.f32.mrf.mxu0 }
  0xdd   :  { %v188_v56 = vpop.f32.mrf.mxu0 }
  0xdf   :  { %v1720_v57 = vpop.f32.mrf.mxu0 }
  0xe1   :  { %v193_v2 = vpop.f32.mrf.mxu0 }
  0xe3   :  { %v1723_v3 = vpop.f32.mrf.mxu0 }
  0xe4   :  { %v1406_v3 = vld [vmem:[%s2450_s5] sm:$0xff] }
  0xe5   :  { %v1955_v27 = vpop.eup %1954 }
  0xe6   :  { %v327_v28 = vsel %vm326_vm3, %v1955_v27, 0.0 }
  0xe7   :  { %1771 = vmatmul.mubr.msk.f32.vlgmr.msra.gmra.mxu1 %vm250_vm4, %v327_v28 }
  0xe8   :  { %1774 = vmatpush3.msra.mxu1 %v2068_v4  ;;  %1781 = vmatprep.mubr.msk.f32.mxu1 %vm2007_vm1, %v2006_v1 }
  0xe9   :  { %1775 = vmatprep.subr.mxu1 %v2006_v1 }
  0xea   :  { %1776 = vmatpush3.msra.mxu1 %v2076_v5 }
  0xeb   :  { %1777 = vmatprep.subr.mxu1 %v2006_v1 }
  0xec   :  { %1778 = vmatpush3.msra.mxu1 %v2088_v7 }
  0xed   :  { %1779 = vmatprep.subr.mxu1 %v2006_v1 }
  0xee   :  { %1780 = vmatpush3.msra.mxu1 %v2101_v9 }
  0xef   :  { %1784 = vmatprep.subr.mxu1 %v2006_v1 }
 0x1a7   :  { %v397_v32 = vpop.f32.mrf.mxu1 }
 0x1a8   :  { %v401_v33 = vadd.f32 %v397_v32, %v173_v29 }
 0x1a9   :  { %v1772_v34 = vpop.f32.mrf.mxu1 }
 0x1aa   :  { %1956 = vtanh.f32 %v401_v33 }
 0x1b7   :  { %v1957_v36 = vpop.eup %1956 }
 0x1b8   :  { %v404_v37 = vsel %vm403_vm5, %v1957_v36, %v327_v28  ;;  %v2304_v36 = vld [vmem:[%s2449_s4 + $0x10] sm:$0xff] }
 0x1b9   :  { %1782 = vmatmul.mubr.msk.f32.vlgmr.msra.gmra.mxu1 %vm250_vm4, %v404_v37 }
 0x1ba   :  { %1785 = vmatpush3.msra.mxu1 %v2068_v4  ;;  %1792 = vmatprep.mubr.msk.f32.mxu1 %vm2007_vm1, %v2006_v1 }
 0x1bb   :  { %1786 = vmatprep.subr.mxu1 %v2006_v1 }
 0x1bc   :  { %1787 = vmatpush3.msra.mxu1 %v2076_v5 }
 0x1bd   :  { %1788 = vmatprep.subr.mxu1 %v2006_v1 }
 0x1be   :  { %1789 = vmatpush3.msra.mxu1 %v2088_v7 }
 0x1bf   :  { %1790 = vmatprep.subr.mxu1 %v2006_v1 }
 0x1c0   :  { %1791 = vmatpush3.msra.mxu1 %v2101_v9 }
 0x1c1   :  { %1795 = vmatprep.subr.mxu1 %v2006_v1 }
 0x279   :  { %v474_v41 = vpop.f32.mrf.mxu1 }
 0x27a   :  { %v478_v42 = vadd.f32 %v474_v41, %v178_v38  ;;  %v2321_v38 = vld [vmem:[%s2449_s4] sm:$0xff] }
 0x27b   :  { %v1783_v43 = vpop.f32.mrf.mxu1 }
 0x27c   :  { %1958 = vtanh.f32 %v478_v42  ;;  %v249_v42 = vld [vmem:[%s2447_s2 + $0x38] sm:$0xff] }
 0x27d   :  { %vm865_vm11 = vcmp.gt.f32.partialorder %v249_v42, 0.0 }
 0x289   :  { %v1959_v45 = vpop.eup %1958 }
 0x28a   :  { %v481_v46 = vsel %vm480_vm6, %v1959_v45, %v404_v37  ;;  %v2312_v37 = vld [vmem:[%s2449_s4 + $0x8] sm:$0xff] }
 0x28b   :  { %1793 = vmatmul.mubr.msk.f32.vlgmr.msra.gmra.mxu1 %vm250_vm4, %v481_v46 }
 0x28c   :  { %1796 = vmatpush3.msra.mxu1 %v2068_v4  ;;  %1803 = vmatprep.mubr.msk.f32.mxu1 %vm2007_vm1, %v2006_v1 }
 0x28d   :  { %1797 = vmatprep.subr.mxu1 %v2006_v1 }
 0x28e   :  { %1798 = vmatpush3.msra.mxu1 %v2076_v5 }
 0x28f   :  { %1799 = vmatprep.subr.mxu1 %v2006_v1 }
 0x290   :  { %1800 = vmatpush3.msra.mxu1 %v2088_v7 }
 0x291   :  { %1801 = vmatprep.subr.mxu1 %v2006_v1 }
 0x292   :  { %1802 = vmatpush3.msra.mxu1 %v2101_v9 }
 0x293   :  { %1806 = vmatprep.subr.mxu1 %v2006_v1 }
 0x34b   :  { %v551_v50 = vpop.f32.mrf.mxu1 }
 0x34c   :  { %v555_v51 = vadd.f32 %v551_v50, %v183_v47 }
 0x34d   :  { %v1794_v52 = vpop.f32.mrf.mxu1 }
 0x34e   :  { %1960 = vtanh.f32 %v555_v51 }
 0x35b   :  { %v1961_v54 = vpop.eup %1960 }
 0x35c   :  { %v558_v55 = vsel %vm557_vm7, %v1961_v54, %v481_v46 }
 0x35d   :  { %1804 = vmatmul.mubr.msk.f32.vlgmr.msra.gmra.mxu1 %vm250_vm4, %v558_v55 }
 0x35e   :  { %1807 = vmatpush3.msra.mxu1 %v2068_v4  ;;  %1814 = vmatprep.mubr.msk.f32.mxu1 %vm2007_vm1, %v2006_v1 }
 0x35f   :  { %1808 = vmatprep.subr.mxu1 %v2006_v1 }
 0x360   :  { %1809 = vmatpush3.msra.mxu1 %v2076_v5 }
 0x361   :  { %1810 = vmatprep.subr.mxu1 %v2006_v1 }
 0x362   :  { %1811 = vmatpush3.msra.mxu1 %v2088_v7 }
 0x363   :  { %1812 = vmatprep.subr.mxu1 %v2006_v1 }
 0x364   :  { %1813 = vmatpush3.msra.mxu1 %v2101_v9 }
 0x365   :  { %1817 = vmatprep.subr.mxu1 %v2006_v1 }
 0x41d   :  { %v628_v59 = vpop.f32.mrf.mxu1 }
 0x41e   :  { %v632_v60 = vadd.f32 %v628_v59, %v188_v56 }
 0x41f   :  { %v1805_v61 = vpop.f32.mrf.mxu1 }
 0x420   :  { %1962 = vtanh.f32 %v632_v60 }
 0x42d   :  { %v1963_v63 = vpop.eup %1962 }
 0x42e   :  { %v635_v0 = vsel %vm634_vm8, %v1963_v63, %v558_v55  ;;  %v1409_v63 = vld [vmem:[%s2450_s5 + $0x18] sm:$0xff] }
 0x42f   :  { %1815 = vmatmul.mubr.msk.f32.vlgmr.msra.gmra.mxu1 %vm250_vm4, %v635_v0 }
 0x430   :  { %1818 = vmatpush3.msra.mxu1 %v2068_v4  ;;  %1825 = vmatprep.mubr.msk.f32.mxu1 %vm2007_vm1, %v2006_v1  ;;  %v41_v4 = vld [vmem:[%s2445_s0 + $0x30] sm:$0xff] }
 0x431   :  { %1819 = vmatprep.subr.mxu1 %v2006_v1  ;;  %1725 = vmatmul.mubr.msk.f32.gmra.mxu0 %vm52_vm2, %v41_v4 }
 0x432   :  { %1820 = vmatpush3.msra.mxu1 %v2076_v5  ;;  %1727 = vmatprep.mubr.msk.f32.mxu0 %vm2007_vm1, %v2006_v1 }
 0x433   :  { %1821 = vmatprep.subr.mxu1 %v2006_v1 }
 0x434   :  { %1822 = vmatpush3.msra.mxu1 %v2088_v7 }
 0x435   :  { %1823 = vmatprep.subr.mxu1 %v2006_v1  ;;  %1728 = vmatmul.mubr.msk.f32.gmra.mxu0 %vm52_vm2, %v42_v14 }
 0x436   :  { %1824 = vmatpush3.msra.mxu1 %v2101_v9  ;;  %1730 = vmatprep.mubr.msk.f32.mxu0 %vm2007_vm1, %v2006_v1 }
 0x437   :  { %1839 = vmatprep.subr.mxu1 %v2006_v1 }
 0x439   :  { %1731 = vmatmul.mubr.msk.f32.gmra.mxu0 %vm52_vm2, %v43_v16 }
 0x43a   :  { %1733 = vmatprep.mubr.msk.f32.mxu0 %vm2007_vm1, %v2006_v1 }
 0x43d   :  { %1734 = vmatmul.mubr.msk.f32.gmra.mxu0 %vm52_vm2, %v44_v17 }
 0x43e   :  { %1736 = vmatprep.mubr.msk.f32.mxu0 %vm2007_vm1, %v2006_v1 }
 0x441   :  { %1737 = vmatmul.mubr.msk.f32.gmra.mxu0 %vm52_vm2, %v45_v19 }
 0x442   :  { %1836 = vmatprep.mubr.msk.f32.mxu0 %vm2007_vm1, %v2006_v1 }
 0x4ef   :  { %v705_v5 = vpop.f32.mrf.mxu1 }
 0x4f0   :  { %v709_v6 = vadd.f32 %v705_v5, %v193_v2  ;;  %v1408_v2 = vld [vmem:[%s2450_s5 + $0x10] sm:$0xff] }
 0x4f1   :  { %v1816_v7 = vpop.f32.mrf.mxu1  ;;  %v198_v11 = vpop.f32.mrf.mxu0 }
 0x4f2   :  { %1964 = vtanh.f32 %v709_v6 }
 0x4f3   :  { %v1726_v12 = vpop.f32.mrf.mxu0 }
 0x4f4   :  { %v1591_v12 = vld [vmem:[%s2451_s6] ss:$0 sm:$0xff]  ;;  %s2008_s6 = smov [#allocation3]  }
 0x4f5   :  { %v203_v27 = vpop.f32.mrf.mxu0  ;;  %s1550_s21 = sshll.u32 %s2008_s6, 4  ;;  %s1551_s21 = int_to_ptr.vmem [resolvable:$true] %s1550_s21 }
 0x4f6   :  { %s1984_s22 = scalar_lea.vmem %s1551_s21, 896  ;;  %p1989_p1 = scmp.lt.s32.totalorder %s1551_s21, %s1551_s21 }
 0x4f7   :  { %v1729_v28 = vpop.f32.mrf.mxu0  ;;  %p1985_p0 = scmp.ne.s32.totalorder %s1551_s21, %s1984_s22  ;;  %p1990_p2 = scmp.lt.s32.totalorder %s1984_s22, %s1984_s22 }
 0x4f9   :  { %v208_v29 = vpop.f32.mrf.mxu0  ;;  %p1991_p3 = por %p1990_p2, %p1989_p1 }
 0x4fb   :  { %v1732_v30 = vpop.f32.mrf.mxu0  ;;  %p1992_p4 = pnand %p1991_p3, %p1985_p0 }
 0x4fd   :  { %v213_v31 = vpop.f32.mrf.mxu0 }
 0x4ff   :  { %v1965_v9 = vpop.eup %1964  ;;  %v1735_v32 = vpop.f32.mrf.mxu0 }
 0x500   :  { %v712_v10 = vsel %vm711_vm9, %v1965_v9, %v635_v0 }
 0x501   :  { %1826 = vmatmul.mubr.msk.f32.vlgmr.msra.gmra.mxu1 %vm250_vm4, %v712_v10  ;;  %v2294_v33 = vpop.f32.mrf.mxu0 }
 0x502   :  { %1847 = vmatprep.mubr.msk.f32.mxu1 %vm2007_vm1, %v2006_v1  ;;  %1840 = vmatpush3.msra.mxu1 %v2299_v35 }
 0x503   :  { %v1738_v34 = vpop.f32.mrf.mxu0  ;;  %1841 = vmatprep.subr.mxu1 %v2006_v1 }
 0x504   :  { %1842 = vmatpush3.msra.mxu1 %v2304_v36 }
 0x505   :  { %1843 = vmatprep.subr.mxu1 %v2006_v1 }
 0x506   :  { %1844 = vmatpush3.msra.mxu1 %v2312_v37 }
 0x507   :  { %1845 = vmatprep.subr.mxu1 %v2006_v1 }
 0x508   :  { %1846 = vmatpush3.msra.mxu1 %v2321_v38 }
 0x509   :  { %1861 = vmatprep.subr.mxu1 %v2006_v1 }
 0x5c1   :  { %v782_v20 = vpop.f32.mrf.mxu1 }
 0x5c2   :  { %v786_v22 = vadd.f32 %v782_v20, %v198_v11 }
 0x5c3   :  { %v1827_v23 = vpop.f32.mrf.mxu1 }
 0x5c4   :  { %1966 = vtanh.f32 %v786_v22 }
 0x5d1   :  { %v1967_v25 = vpop.eup %1966 }
 0x5d2   :  { %v789_v26 = vsel %vm788_vm10, %v1967_v25, %v712_v10 }
 0x5d3   :  { %1837 = vmatmul.mubr.msk.f32.vlgmr.msra.gmra.mxu0 %vm250_vm4, %v789_v26 }
 0x5d4   :  { %1858 = vmatprep.mubr.msk.f32.mxu0 %vm2007_vm1, %v2006_v1  ;;  %1851 = vmatpush3.msra.mxu0 %v2299_v35 }
 0x5d5   :  { %1852 = vmatprep.subr.mxu0 %v2006_v1 }
 0x5d6   :  { %1853 = vmatpush3.msra.mxu0 %v2304_v36 }
 0x5d7   :  { %1854 = vmatprep.subr.mxu0 %v2006_v1 }
 0x5d8   :  { %1855 = vmatpush3.msra.mxu0 %v2312_v37 }
 0x5d9   :  { %1856 = vmatprep.subr.mxu0 %v2006_v1 }
 0x5da   :  { %1857 = vmatpush3.msra.mxu0 %v2321_v38 }
 0x5db   :  { %1872 = vmatprep.subr.mxu0 %v2006_v1 }
 0x693   :  { %v859_v39 = vpop.f32.mrf.mxu0 }
 0x694   :  { %v863_v40 = vadd.f32 %v859_v39, %v203_v27 }
 0x695   :  { %v1838_v41 = vpop.f32.mrf.mxu0 }
 0x696   :  { %1968 = vtanh.f32 %v863_v40 }
 0x6a3   :  { %v1969_v43 = vpop.eup %1968 }
 0x6a4   :  { %v866_v44 = vsel %vm865_vm11, %v1969_v43, %v789_v26 }
 0x6a5   :  { %1848 = vmatmul.mubr.msk.f32.vlgmr.msra.gmra.mxu1 %vm250_vm4, %v866_v44 }
 0x6a6   :  { %1862 = vmatpush3.msra.mxu1 %v2299_v35  ;;  %1869 = vmatprep.mubr.msk.f32.mxu1 %vm2007_vm1, %v2006_v1 }
 0x6a7   :  { %1863 = vmatprep.subr.mxu1 %v2006_v1 }
 0x6a8   :  { %1864 = vmatpush3.msra.mxu1 %v2304_v36 }
 0x6a9   :  { %1865 = vmatprep.subr.mxu1 %v2006_v1 }
 0x6aa   :  { %1866 = vmatpush3.msra.mxu1 %v2312_v37 }
 0x6ab   :  { %1867 = vmatprep.subr.mxu1 %v2006_v1 }
 0x6ac   :  { %1868 = vmatpush3.msra.mxu1 %v2321_v38 }
 0x6ad   :  { %1883 = vmatprep.subr.mxu1 %v2006_v1 }
 0x765   :  { %v936_v45 = vpop.f32.mrf.mxu1 }
 0x766   :  { %v940_v46 = vadd.f32 %v936_v45, %v208_v29 }
 0x767   :  { %v1849_v47 = vpop.f32.mrf.mxu1 }
 0x768   :  { %1970 = vtanh.f32 %v940_v46 }
 0x775   :  { %v1971_v48 = vpop.eup %1970 }
 0x776   :  { %942 = vst.msk [vmem:[#allocation2] sm:$0xff] %vm250_vm4, %v1971_v48  ;;  %1859 = vmatmul.mubr.msk.f32.vlgmr.msra.gmra.mxu0 %vm250_vm4, %v1971_v48 }
 0x777   :  { %1873 = vmatpush3.msra.mxu0 %v2299_v35  ;;  %1880 = vmatprep.mubr.msk.f32.mxu0 %vm2007_vm1, %v2006_v1 }
 0x778   :  { %1874 = vmatprep.subr.mxu0 %v2006_v1 }
 0x779   :  { %1875 = vmatpush3.msra.mxu0 %v2304_v36 }
 0x77a   :  { %1876 = vmatprep.subr.mxu0 %v2006_v1 }
 0x77b   :  { %1877 = vmatpush3.msra.mxu0 %v2312_v37 }
 0x77c   :  { %1878 = vmatprep.subr.mxu0 %v2006_v1 }
 0x77d   :  { %1879 = vmatpush3.msra.mxu0 %v2321_v38  ;;  %v1399_v4 = vld [vmem:[#allocation2] sm:$0xff] }
 0x77e   :  { %1894 = vmatprep.subr.mxu0 %v2006_v1 }
 0x836   :  { %v1012_v49 = vpop.f32.mrf.mxu0 }
 0x837   :  { %v1016_v50 = vadd.f32 %v1012_v49, %v213_v31 }
 0x838   :  { %v1860_v51 = vpop.f32.mrf.mxu0 }
 0x839   :  { %1972 = vtanh.f32 %v1016_v50 }
 0x846   :  { %v1973_v52 = vpop.eup %1972 }
 0x847   :  { %1018 = vst.msk [vmem:[#allocation2 + $0x8] sm:$0xff] %vm250_vm4, %v1973_v52  ;;  %1870 = vmatmul.mubr.msk.f32.vlgmr.msra.gmra.mxu1 %vm250_vm4, %v1973_v52 }
 0x848   :  { %1884 = vmatpush3.msra.mxu1 %v2299_v35  ;;  %1891 = vmatprep.mubr.msk.f32.mxu1 %vm2007_vm1, %v2006_v1 }
 0x849   :  { %1885 = vmatprep.subr.mxu1 %v2006_v1 }
 0x84a   :  { %1886 = vmatpush3.msra.mxu1 %v2304_v36 }
 0x84b   :  { %1887 = vmatprep.subr.mxu1 %v2006_v1 }
 0x84c   :  { %1888 = vmatpush3.msra.mxu1 %v2312_v37 }
 0x84d   :  { %1889 = vmatprep.subr.mxu1 %v2006_v1 }
 0x84e   :  { %1890 = vmatpush3.msra.mxu1 %v2321_v38  ;;  %v1400_v5 = vld [vmem:[#allocation2 + $0x8] sm:$0xff] }
 0x84f   :  { %1905 = vmatprep.subr.mxu1 %v2006_v1 }
 0x907   :  { %v1088_v53 = vpop.f32.mrf.mxu1 }
 0x908   :  { %v1092_v54 = vadd.f32 %v1088_v53, %v2294_v33 }
 0x909   :  { %v1871_v55 = vpop.f32.mrf.mxu1 }
 0x90a   :  { %1974 = vtanh.f32 %v1092_v54 }
 0x917   :  { %v1975_v56 = vpop.eup %1974 }
 0x918   :  { %1094 = vst.msk [vmem:[#allocation2 + $0x10] sm:$0xff] %vm250_vm4, %v1975_v56  ;;  %1881 = vmatmul.mubr.msk.f32.vlgmr.msra.gmra.mxu0 %vm250_vm4, %v1975_v56 }
 0x919   :  { %1895 = vmatpush3.msra.mxu0 %v2299_v35  ;;  %1902 = vmatprep.mubr.msk.f32.mxu0 %vm2007_vm1, %v2006_v1 }
 0x91a   :  { %1896 = vmatprep.subr.mxu0 %v2006_v1 }
 0x91b   :  { %1897 = vmatpush3.msra.mxu0 %v2304_v36 }
 0x91c   :  { %1898 = vmatprep.subr.mxu0 %v2006_v1 }
 0x91d   :  { %1899 = vmatpush3.msra.mxu0 %v2312_v37 }
 0x91e   :  { %1900 = vmatprep.subr.mxu0 %v2006_v1 }
 0x91f   :  { %1901 = vmatpush3.msra.mxu0 %v2321_v38  ;;  %v1401_v6 = vld [vmem:[#allocation2 + $0x10] sm:$0xff] }
 0x920   :  { %1916 = vmatprep.subr.mxu0 %v2006_v1 }
 0x9d8   :  { %v1164_v57 = vpop.f32.mrf.mxu0 }
 0x9d9   :  { %v1168_v58 = vadd.f32 %v1164_v57, %v2150_v13 }
 0x9da   :  { %v1882_v59 = vpop.f32.mrf.mxu0 }
 0x9db   :  { %1976 = vtanh.f32 %v1168_v58 }
 0x9e8   :  { %v1977_v60 = vpop.eup %1976 }
 0x9e9   :  { %1170 = vst.msk [vmem:[#allocation2 + $0x18] sm:$0xff] %vm250_vm4, %v1977_v60  ;;  %1892 = vmatmul.mubr.msk.f32.vlgmr.msra.gmra.mxu1 %vm250_vm4, %v1977_v60 }
 0x9ea   :  { %1906 = vmatpush3.msra.mxu1 %v2299_v35  ;;  %1913 = vmatprep.mubr.msk.f32.mxu1 %vm2007_vm1, %v2006_v1 }
 0x9eb   :  { %1907 = vmatprep.subr.mxu1 %v2006_v1 }
 0x9ec   :  { %1908 = vmatpush3.msra.mxu1 %v2304_v36 }
 0x9ed   :  { %1909 = vmatprep.subr.mxu1 %v2006_v1 }
 0x9ee   :  { %1910 = vmatpush3.msra.mxu1 %v2312_v37 }
 0x9ef   :  { %1911 = vmatprep.subr.mxu1 %v2006_v1 }
 0x9f0   :  { %1912 = vmatpush3.msra.mxu1 %v2321_v38  ;;  %v1402_v7 = vld [vmem:[#allocation2 + $0x18] sm:$0xff] }
 0xaa9   :  { %v1240_v13 = vpop.f32.mrf.mxu1 }
 0xaaa   :  { %v1244_v61 = vadd.f32 %v1240_v13, %v2152_v15  ;;  %v1407_v15 = vld [vmem:[%s2450_s5 + $0x8] sm:$0xff] }
 0xaab   :  { %v1893_v62 = vpop.f32.mrf.mxu1 }
 0xaac   :  { %1978 = vtanh.f32 %v1244_v61 }
 0xab9   :  { %v1979_v0 = vpop.eup %1978 }
 0xaba   :  { %1246 = vst.msk [vmem:[#allocation2 + $0x20] sm:$0xff] %vm250_vm4, %v1979_v0  ;;  %1903 = vmatmul.mubr.msk.f32.vlgmr.msra.gmra.mxu0 %vm250_vm4, %v1979_v0 }
 0xabb   :  { %1917 = vmatpush3.msra.mxu0 %v1409_v63  ;;  %1924 = vmatprep.mubr.msk.f32.mxu0 %vm2007_vm1, %v2006_v1 }
 0xabc   :  { %1918 = vmatprep.subr.mxu0 %v2006_v1 }
 0xabd   :  { %1919 = vmatpush3.msra.mxu0 %v1408_v2 }
 0xabe   :  { %1920 = vmatprep.subr.mxu0 %v2006_v1 }
 0xabf   :  { %1921 = vmatpush3.msra.mxu0 %v1407_v15 }
 0xac0   :  { %1922 = vmatprep.subr.mxu0 %v2006_v1 }
 0xac1   :  { %1923 = vmatpush3.msra.mxu0 %v1406_v3  ;;  %v1403_v8 = vld [vmem:[#allocation2 + $0x20] sm:$0xff] }
 0xac2   :  { %1925 = vmatmul.mubr.msk.f32.vlgmr.msra.gmra.mxu0 %vm250_vm4, %v1399_v4 }
 0xac3   :  { %1927 = vmatprep.mubr.msk.f32.mxu0 %vm2007_vm1, %v2006_v1 }
 0xac6   :  { %1928 = vmatmul.mubr.msk.f32.gmra.mxu0 %vm250_vm4, %v1400_v5 }
 0xac7   :  { %1930 = vmatprep.mubr.msk.f32.mxu0 %vm2007_vm1, %v2006_v1 }
 0xaca   :  { %1931 = vmatmul.mubr.msk.f32.gmra.mxu0 %vm250_vm4, %v1401_v6 }
 0xacb   :  { %1933 = vmatprep.mubr.msk.f32.mxu0 %vm2007_vm1, %v2006_v1 }
 0xace   :  { %1934 = vmatmul.mubr.msk.f32.gmra.mxu0 %vm250_vm4, %v1402_v7 }
 0xacf   :  { %1936 = vmatprep.mubr.msk.f32.mxu0 %vm2007_vm1, %v2006_v1 }
 0xad2   :  { %1937 = vmatmul.mubr.msk.f32.gmra.mxu0 %vm250_vm4, %v1403_v8 }
 0xad3   :  { %1939 = vmatprep.mubr.msk.f32.mxu0 %vm2007_vm1, %v2006_v1 }
 0xb7a   :  { %v1316_v9 = vpop.f32.mrf.mxu0 }
 0xb7b   :  { %v1320_v10 = vadd.f32 %v1316_v9, %v2154_v18 }
 0xb7c   :  { %v1904_v11 = vpop.f32.mrf.mxu0 }
 0xb7d   :  { %1980 = vtanh.f32 %v1320_v10 }
 0xb82   :  { %v1504_v14 = vpop.f32.mrf.mxu0 }
 0xb83   :  { %v1505_v16 = vadd.f32 %v1591_v12, %v1504_v14 }
 0xb84   :  { %v1926_v17 = vpop.f32.mrf.mxu0 }
 0xb85   :  { %1538 = vst [vmem:[#allocation3] sm:$0xff] %v1505_v16 }
 0xb86   :  { %v1509_v19 = vpop.f32.mrf.mxu0 }
 0xb87   :  { %v1510_v20 = vadd.f32 %v1591_v12, %v1509_v19 }
 0xb88   :  { %v1929_v22 = vpop.f32.mrf.mxu0 }
 0xb89   :  { %1539 = vst [vmem:[#allocation3 + $0x8] sm:$0xff] %v1510_v20 }
 0xb8a   :  { %v1981_v23 = vpop.eup %1980  ;;  %v1514_v24 = vpop.f32.mrf.mxu0 }
 0xb8b   :  { %1322 = vst.msk [vmem:[#allocation2 + $0x28] sm:$0xff] %vm250_vm4, %v1981_v23  ;;  %v1515_v25 = vadd.f32 %v1591_v12, %v1514_v24  ;;  %1914 = vmatmul.mubr.msk.f32.vlgmr.msra.gmra.mxu1 %vm250_vm4, %v1981_v23 }
 0xb8c   :  { %v1932_v18 = vpop.f32.mrf.mxu0 }
 0xb8d   :  { %1540 = vst [vmem:[#allocation3 + $0x10] sm:$0xff] %v1515_v25 }
 0xb8e   :  { %v1519_v26 = vpop.f32.mrf.mxu0 }
 0xb8f   :  { %v1520_v27 = vadd.f32 %v1591_v12, %v1519_v26 }
 0xb90   :  { %v1935_v28 = vpop.f32.mrf.mxu0 }
 0xb91   :  { %1541 = vst [vmem:[#allocation3 + $0x18] sm:$0xff] %v1520_v27 }
 0xb92   :  { %v1524_v29 = vpop.f32.mrf.mxu0  ;;  %v1404_v30 = vld [vmem:[#allocation2 + $0x28] sm:$0xff] }
 0xb93   :  { %v1525_v31 = vadd.f32 %v1591_v12, %v1524_v29  ;;  %1940 = vmatmul.mubr.msk.f32.gmra.mxu0 %vm250_vm4, %v1404_v30 }
 0xb94   :  { %v1938_v32 = vpop.f32.mrf.mxu0  ;;  %1942 = vmatprep.mubr.msk.f32.mxu0 %vm2007_vm1, %v2006_v1 }
 0xb95   :  { %1542 = vst [vmem:[#allocation3 + $0x20] sm:$0xff] %v1525_v31 }
 0xc4b   :  { %v1392_v33 = vpop.f32.mrf.mxu1 }
 0xc4c   :  { %v1396_v34 = vadd.f32 %v1392_v33, %v2156_v21 }
 0xc4d   :  { %v1915_v35 = vpop.f32.mrf.mxu1 }
 0xc4e   :  { %1982 = vtanh.f32 %v1396_v34 }
 0xc53   :  { %v1529_v36 = vpop.f32.mrf.mxu0 }
 0xc54   :  { %v1530_v37 = vadd.f32 %v1591_v12, %v1529_v36 }
 0xc55   :  { %v1941_v38 = vpop.f32.mrf.mxu0 }
 0xc56   :  { %1543 = vst [vmem:[#allocation3 + $0x28] sm:$0xff] %v1530_v37 }
 0xc5b   :  { %v1983_v39 = vpop.eup %1982 }
 0xc5c   :  { %1398 = vst.msk [vmem:[#allocation2 + $0x30] sm:$0xff] %vm250_vm4, %v1983_v39 }
 0xc63   :  { %v1405_v40 = vld [vmem:[#allocation2 + $0x30] sm:$0xff] }
 0xc64   :  { %1943 = vmatmul.mubr.msk.f32.gmra.mxu0 %vm250_vm4, %v1405_v40 }
 0xd24   :  { %v1534_v41 = vpop.f32.mrf.mxu0 }
 0xd25   :  { %v1535_v1 = vadd.f32 %v1591_v12, %v1534_v41 }
 0xd26   :  { %v1944_v42 = vpop.f32.mrf.mxu0 }
 0xd27   :  { %1544 = vst [vmem:[#allocation3 + $0x30] sm:$0xff] %v1535_v1 }
 0xd28   :  { %1995 = shalt.err (!%p1992_p4)
}
 0xd29   :  { %s2009_s23 = smov 128   ;;  %s2010_s24 = smov 8  }
 0xd2a   :  { %1556 = dma.vmem_to_hbm [thread:$0]  %s1551_s21, 896, %s2452_s7, [#allocation4], %s2009_s23, %s2009_s23, %s2010_s24  }
 0xd2b   :  { %2004 = dma.done.wait [#allocation4], 896  }
 0xd2c   :  { %2005 = vsyncadd [#allocation4], 4294966400 }
 0xd2d   :  { %1560 = vsyncpa [#allocation4], 1 }

</bundles_post_ra>
